<compile_context>
chip_gen: v7x
topology: tpu7x:2x2x1
jax: 0.10.0
libtpu: 0.0.40
codegen_flags: <defaults>
</compile_context>

<pallas_src>
import jax
import jax.numpy as jnp
from jax.experimental import pallas as pl
from jax.experimental.pallas import tpu as pltpu

DEFAULT_TILE_R = 1024    # row tile for the fused MLP kernels (perf review: 1K-2K)
DEFAULT_N_TILE = 256     # node tile (one-hot width) for the segmented scatter
DEFAULT_E_TILE = 1024    # edge tile for the segmented scatter
_MIN_SPLIT_ROWS = 512    # split a single row tile in two when R >= this (v7x 2 TCs)
_MIB = 1024 * 1024


def _round_up(v, m):
    return (v + m - 1) // m * m


def _pad_lanes(w):
    # VMEM blocks are lane-padded to 128; use this for scoped-VMEM estimates.
    return _round_up(max(int(w), 1), 128)


def _vmem_limit(est_bytes):
    # Explicit scoped-VMEM request, clamped to a value safe on every chip
    # (<= 32 MiB scoped default on v6e/v7x; raises v5e's 16 MiB when needed).
    return int(min(32 * _MIB, max(8 * _MIB, 2 * int(est_bytes))))


# --------------------------------------------------------------------------
# Lane-dense output capability probe
# The [tile_r, D] -> [tile_r*D//128, 128] in-kernel reshape removes masked
# narrow-lane stores (D=32 < 128).  Mosaic reshape support for this pattern is
# checked once with a tiny value-verified kernel; if unsupported we fall back
# to the plain [tile_r, D] output block.
# --------------------------------------------------------------------------
_LANE_DENSE_SUPPORTED = None


def _lane_dense_supported():
    global _LANE_DENSE_SUPPORTED
    if _LANE_DENSE_SUPPORTED is None:
        def _probe(x_ref, o_ref):
            o_ref[...] = x_ref[...].reshape(o_ref.shape)

        try:
            x = jnp.arange(256 * 32, dtype=jnp.float32).reshape(256, 32)
            y = pl.pallas_call(
                _probe,
                out_shape=jax.ShapeDtypeStruct((64, 128), jnp.float32))(x)
            _LANE_DENSE_SUPPORTED = bool(jnp.array_equal(y, x.reshape(64, 128)))
        except Exception:
            _LANE_DENSE_SUPPORTED = False
    return _LANE_DENSE_SUPPORTED


# --------------------------------------------------------------------------
# Fused MLP kernels
#   h0 = (split first Linear over the logical concat inputs) ; ReLU
#   h  = Linear/ReLU chain ; final Linear ; affine-free LayerNorm [; + residual]
# --------------------------------------------------------------------------
def _mlp_tail(h, wb_refs, n_layers, layer_norm, mxu_dtype, eps=1e-5):
    """Layers 1..n_layers-1 (+LayerNorm) on the f32 pre-activation of layer 0."""
    if n_layers > 1:                      # ReLU after hidden layer 0
        h = jnp.maximum(h, 0.0)
    for l in range(1, n_layers):
        w = wb_refs[2 * (l - 1)][...]
        b = wb_refs[2 * (l - 1) + 1][...]
        lhs = h if mxu_dtype is None else h.astype(mxu_dtype)
        rhs = w if mxu_dtype is None else w.astype(mxu_dtype)
        h = jnp.dot(lhs, rhs, preferred_element_type=jnp.float32) + b
        if l < n_layers - 1:              # ReLU after every hidden layer
            h = jnp.maximum(h, 0.0)
    if layer_norm:                        # LayerNorm(elementwise_affine=False)
        mean = jnp.mean(h, axis=-1, keepdims=True)
        var = jnp.mean(jnp.square(h - mean), axis=-1, keepdims=True)
        h = (h - mean) * jax.lax.rsqrt(var + eps)
    return h


def _make_edge_mlp_kernel(n_layers, layer_norm, lane_dense, mxu_dtype):
    # inputs: pos_i, pos_j, x_i, x_j ; W0 split into (dir, norm, x_i, x_j) pieces.
    # The fiber (dir, ||dir||) and the concat are built inside the kernel, so no
    # [E, 2L+pos+1] array ever touches HBM.
    def kernel(pi_ref, pj_ref, xi_ref, xj_ref, w_dir, w_nrm, w_xi, w_xj, b0, *rest):
        out_ref = rest[-1]
        wb = rest[:-1]

        def mm(a, w_ref):
            a_ = a if mxu_dtype is None else a.astype(mxu_dtype)
            w_ = w_ref[...] if mxu_dtype is None else w_ref[...].astype(mxu_dtype)
            return jnp.dot(a_, w_, preferred_element_type=jnp.float32)

        d = pi_ref[...].astype(jnp.float32) - pj_ref[...].astype(jnp.float32)
        nrm = jnp.sqrt(jnp.sum(d * d, axis=-1, keepdims=True))       # [tile_r, 1]
        h = (mm(d, w_dir)
             + nrm * w_nrm[...]                 # K=1 "matmul" folded onto the VPU
             + mm(xi_ref[...].astype(jnp.float32), w_xi)
             + mm(xj_ref[...].astype(jnp.float32), w_xj)
             + b0[...])
        h = _mlp_tail(h, wb, n_layers, layer_norm, mxu_dtype)
        if lane_dense:
            h = h.reshape(out_ref.shape)        # lane-dense slab, no masked vst
        out_ref[...] = h.astype(out_ref.dtype)

    return kernel


def _make_node_mlp_kernel(n_layers, layer_norm, lane_dense, mxu_dtype):
    # inputs: x, aggr ; W0 split so the cat([x, aggr]) never exists; residual fused.
    def kernel(x_ref, a_ref, w0x, w0a, b0, *rest):
        out_ref = rest[-1]
        wb = rest[:-1]

        def mm(a, w_ref):
            a_ = a if mxu_dtype is None else a.astype(mxu_dtype)
            w_ = w_ref[...] if mxu_dtype is None else w_ref[...].astype(mxu_dtype)
            return jnp.dot(a_, w_, preferred_element_type=jnp.float32)

        x = x_ref[...].astype(jnp.float32)
        h = mm(x, w0x) + mm(a_ref[...].astype(jnp.float32), w0a) + b0[...]
        h = _mlp_tail(h, wb, n_layers, layer_norm, mxu_dtype)
        h = h + x                               # fused residual
        if lane_dense:
            h = h.reshape(out_ref.shape)
        out_ref[...] = h.astype(out_ref.dtype)

    return kernel


def _row_mlp_call(make_kernel, row_inputs, weight_inputs, Dout, out_dtype,
                  n_layers, layer_norm, tile_r, mxu_dtype):
    """Shared row-tiled driver for the fused MLP kernels."""
    R = row_inputs[0].shape[0]
    rows = _round_up(R, 8)
    tile_r = _round_up(max(int(tile_r), 8), 8)
    if rows <= tile_r:
        # v7x megacore: give the "parallel" row axis >= 2 tiles when it is big
        # enough to be worth splitting across the 2 TensorCores.
        tile_r = _round_up((R + 1) // 2, 8) if rows >= _MIN_SPLIT_ROWS else rows

    # Lane-dense output slab: pack 128//Dout rows per 128-lane output row.
    lane_dense = (Dout < 128 and 128 % Dout == 0 and _lane_dense_supported())
    group = 128 // Dout if lane_dense else 1
    if lane_dense:
        tile_r = _round_up(tile_r, 8 * group)
    Rp = _round_up(R, tile_r)
    grid = (Rp // tile_r,)

    def pad_rows(a):
        return jnp.pad(a, ((0, Rp - a.shape[0]), (0, 0))) if a.shape[0] != Rp else a

    args, in_specs = [], []
    for a in row_inputs:
        args.append(pad_rows(a))
        in_specs.append(pl.BlockSpec((tile_r, a.shape[1]), lambda r: (r, 0)))
    for w in weight_inputs:
        args.append(w)
        in_specs.append(pl.BlockSpec(w.shape, lambda r: (0, 0)))

    if lane_dense:
        out_shape = jax.ShapeDtypeStruct((Rp * Dout // 128, 128), out_dtype)
        out_spec = pl.BlockSpec((tile_r * Dout // 128, 128), lambda r: (r, 0))
    else:
        out_shape = jax.ShapeDtypeStruct((Rp, Dout), out_dtype)
        out_spec = pl.BlockSpec((tile_r, Dout), lambda r: (r, 0))

    # Scoped VMEM: weights + double-buffered (lane-padded) in/out tiles + a few
    # live f32 activation temporaries.
    est = (4 * sum(int(w.size) for w in weight_inputs)
           + 4 * sum(2 * tile_r * _pad_lanes(a.shape[1]) for a in row_inputs)
           + 4 * 4 * tile_r * _pad_lanes(Dout)
           + 4 * 2 * tile_r * _pad_lanes(Dout))

    out = pl.pallas_call(
        make_kernel(n_layers, layer_norm, lane_dense, mxu_dtype),
        out_shape=out_shape,
        grid=grid,
        in_specs=in_specs,
        out_specs=out_spec,
        compiler_params=pltpu.CompilerParams(
            dimension_semantics=("parallel",),
            vmem_limit_bytes=_vmem_limit(est)),
    )(*args)
    if lane_dense:
        out = out.reshape(Rp, Dout)
    return out[:R]


def edge_mlp_pallas(pos_i, pos_j, x_i, x_j, weights, biases, *, layer_norm=True,
                    tile_r=DEFAULT_TILE_R, mxu_dtype=None):
    """Edge MLP with the fiber/concat construction fused into the kernel."""
    n_layers = len(weights)
    L = x_i.shape[1]
    P = pos_i.shape[1]
    w0 = weights[0]
    assert w0.shape[0] == 2 * L + P + 1
    w_dir = w0[:P]
    w_nrm = w0[P:P + 1]
    w_xi = w0[P + 1:P + 1 + L]
    w_xj = w0[P + 1 + L:]
    weight_inputs = [w_dir, w_nrm, w_xi, w_xj, biases[0]]
    for w, b in zip(weights[1:], biases[1:]):
        weight_inputs += [w, b]
    return _row_mlp_call(_make_edge_mlp_kernel, [pos_i, pos_j, x_i, x_j],
                         weight_inputs, weights[-1].shape[1], x_i.dtype,
                         n_layers, layer_norm, tile_r, mxu_dtype)


def node_mlp_pallas(x, aggr, weights, biases, *, layer_norm=True,
                    tile_r=DEFAULT_TILE_R, mxu_dtype=None):
    """Node MLP with split-W0 concat elision and the residual `+ x` fused in."""
    n_layers = len(weights)
    L = x.shape[1]
    w0 = weights[0]
    assert w0.shape[0] == 2 * L and weights[-1].shape[1] == L
    weight_inputs = [w0[:L], w0[L:], biases[0]]
    for w, b in zip(weights[1:], biases[1:]):
        weight_inputs += [w, b]
    return _row_mlp_call(_make_node_mlp_kernel, [x, aggr], weight_inputs, L,
                         x.dtype, n_layers, layer_norm, tile_r, mxu_dtype)


# --------------------------------------------------------------------------
# Segmented scatter_sum:  aggr[n] = sum_{e : j[e]==n} edge_emb[e]
# Edges are argsorted by j and packed (XLA) into per-node-block, e_tile-aligned
# regions; a 1-D grid walks edge blocks once (O(E)).  Scalar-prefetched per-block
# metadata provides the output node-block index (data-dependent out index_map),
# init/flush flags, and a clamped input block index so worst-case tail blocks do
# no DMA/compute.  Per block: one_hot(local j) contracted with emb on the MXU,
# accumulated into a VMEM f32 scratch (matches PyTorch's f32 scatter_add).
# --------------------------------------------------------------------------
def _scatter_seg_kernel(in_blk_ref, out_nb_ref, flags_ref, emb_ref, jloc_ref,
                        out_ref, acc_ref):
    del in_blk_ref, out_nb_ref
    b = pl.program_id(0)
    f = flags_ref[b]

    @pl.when((f & 1) != 0)                      # real (non-tail) edge block
    def _():
        @pl.when((f & 2) != 0)                  # first block of this node tile
        def _():
            acc_ref[...] = jnp.zeros_like(acc_ref)

        e_tile = emb_ref.shape[0]
        n_tile = acc_ref.shape[0]
        # local node ids -> fixed 0..n_tile-1 iota, no per-step offset add (VALU cut)
        cols = jax.lax.broadcasted_iota(jnp.int32, (e_tile, n_tile), 1)
        onehot = (jloc_ref[...] == cols).astype(jnp.float32)        # [e_tile, n_tile]
        acc_ref[...] += jax.lax.dot_general(
            onehot, emb_ref[...].astype(jnp.float32),
            dimension_numbers=(((0,), (0,)), ((), ())),             # contract over edges
            preferred_element_type=jnp.float32)                     # [n_tile, D]

        @pl.when((f & 4) != 0)                  # last block of this node tile
        def _():
            out_ref[...] = acc_ref[...].astype(out_ref.dtype)


def scatter_sum_pallas(edge_emb, j, num_nodes, *,
                       n_tile=DEFAULT_N_TILE, e_tile=DEFAULT_E_TILE):
    E, D = edge_emb.shape
    N = int(num_nodes)
    n_tile = _round_up(min(int(n_tile), _round_up(N, 8)), 8)
    e_tile = _round_up(min(int(e_tile), _round_up(E, 8)), 8)
    Np = _round_up(N, n_tile)
    NB = Np // n_tile
    G = -(-E // e_tile) + NB          # static worst-case number of edge blocks
    P = G * e_tile                    # padded edge rows (static)

    # ---- XLA prep: sort by target node, pack per-node-block CSR regions ------
    j = j.astype(jnp.int32)
    order = jnp.argsort(j)
    j_s = j[order]
    emb_s = edge_emb[order]
    nb_e = j_s // n_tile                                            # node block per edge
    counts = jnp.zeros((NB,), jnp.int32).at[nb_e].add(1)
    blocks_nb = jnp.maximum((counts + e_tile - 1) // e_tile, 1)     # >=1 so every
    rows_nb = blocks_nb * e_tile                                    # node block is written
    row_start = jnp.concatenate([jnp.zeros((1,), jnp.int32),
                                 jnp.cumsum(rows_nb)[:-1].astype(jnp.int32)])
    edge_start = jnp.concatenate([jnp.zeros((1,), jnp.int32),
                                  jnp.cumsum(counts)[:-1].astype(jnp.int32)])
    dest = row_start[nb_e] + jnp.arange(E, dtype=jnp.int32) - edge_start[nb_e]
    emb_p = jnp.zeros((P, D), edge_emb.dtype).at[dest].set(emb_s)
    # padded / unused rows get local id -1 which never matches a one-hot column
    jloc_p = jnp.full((P, 1), -1, jnp.int32).at[dest].set(
        (j_s - nb_e * n_tile)[:, None])

    # ---- per-block metadata (scalar-prefetched into SMEM) --------------------
    blk_cum = jnp.cumsum(blocks_nb).astype(jnp.int32)
    nreal = blk_cum[-1]                                             # dynamic #real blocks
    b_idx = jnp.arange(G, dtype=jnp.int32)
    nb_raw = jnp.searchsorted(blk_cum, b_idx, side="right").astype(jnp.int32)
    valid = b_idx < nreal
    out_nb = jnp.where(valid, nb_raw, NB - 1).astype(jnp.int32)     # clamped for out map
    in_blk = jnp.minimum(b_idx, nreal - 1).astype(jnp.int32)        # tail -> no new DMA
    prev_nb = jnp.concatenate([jnp.full((1,), -1, jnp.int32), nb_raw[:-1]])
    next_nb = jnp.concatenate([nb_raw[1:], jnp.full((1,), -2, jnp.int32)])
    flags = (valid.astype(jnp.int32)
             + 2 * (valid & (nb_raw != prev_nb)).astype(jnp.int32)
             + 4 * (valid & (nb_raw != next_nb)).astype(jnp.int32))

    est = 4 * (2 * e_tile * _pad_lanes(D)       # emb blocks (double-buffered)
               + 2 * e_tile * 128               # lane-padded jloc blocks
               + 2 * e_tile * n_tile            # one-hot + iota temporaries
               + 3 * n_tile * _pad_lanes(D))    # accumulator + out blocks

    # TODO(synk): on v7x the 1-D reduction grid runs on a single TensorCore;
    # splitting the edge range at a node-block boundary across 2 cores would
    # recover the second TC for very large graphs.
    out = pl.pallas_call(
        _scatter_seg_kernel,
        out_shape=jax.ShapeDtypeStruct((Np, D), edge_emb.dtype),
        grid_spec=pltpu.PrefetchScalarGridSpec(
            num_scalar_prefetch=3,
            grid=(G,),
            in_specs=[
                pl.BlockSpec((e_tile, D),
                             lambda b, inb, onb, flg: (inb[b], 0)),
                pl.BlockSpec((e_tile, 1),
                             lambda b, inb, onb, flg: (inb[b], 0)),
            ],
            out_specs=pl.BlockSpec((n_tile, D),
                                   lambda b, inb, onb, flg: (onb[b], 0)),
            scratch_shapes=[pltpu.VMEM((n_tile, D), jnp.float32)],
        ),
        compiler_params=pltpu.CompilerParams(
            dimension_semantics=("arbitrary",),
            vmem_limit_bytes=_vmem_limit(est)),
    )(in_blk, out_nb, flags, emb_p, jloc_p)
    return out[:N]


# --------------------------------------------------------------------------
# Parameter init (deterministic, PyTorch-Linear-style uniform bounds)
# --------------------------------------------------------------------------
def init_linear(key, d_in, d_out):
    k1, k2 = jax.random.split(key)
    bound = 1.0 / float(d_in) ** 0.5
    w = jax.random.uniform(k1, (d_in, d_out), jnp.float32, -bound, bound)
    b = jax.random.uniform(k2, (1, d_out), jnp.float32, -bound, bound)
    return w, b


def init_mlp(key, input_dim, latent_dim, output_dim, hidden_layers):
    dims = [input_dim] + [latent_dim] * hidden_layers + [output_dim]
    ws, bs = [], []
    keys = jax.random.split(key, len(dims) - 1)
    for k, (din, dout) in zip(keys, zip(dims[:-1], dims[1:])):
        w, b = init_linear(k, din, dout)
        ws.append(w)
        bs.append(b)
    return ws, bs


def init_gmp(key, latent_dim, hidden_layer, pos_dim):
    k1, k2 = jax.random.split(key)
    node_w, node_b = init_mlp(k1, 2 * latent_dim, latent_dim, latent_dim, hidden_layer)
    edge_w, edge_b = init_mlp(k2, 2 * latent_dim + pos_dim + 1, latent_dim,
                              latent_dim, hidden_layer)
    return dict(node_w=node_w, node_b=node_b, edge_w=edge_w, edge_b=edge_b)


# --------------------------------------------------------------------------
# GMP forward (un-batched [N, C] path of the PyTorch module)
# --------------------------------------------------------------------------
def gmp_forward(params, x, g, pos, *, tile_r=DEFAULT_TILE_R,
                n_tile=DEFAULT_N_TILE, e_tile=DEFAULT_E_TILE, mxu_dtype=None):
    # mxu_dtype=jnp.bfloat16 feeds bf16 to the MXU dots on v6e/v7x (elementwise
    # math stays f32); left None by default because it loosens the tolerance vs
    # the PyTorch f32 reference.
    i, j = g[0], g[1]

    # Row gathers stay in XLA; the fiber/concat construction is fused into the
    # edge-MLP kernel so no [E, 2L+pos+1] array is materialized.
    # TODO(synk): fuse the x/pos row gathers themselves into the edge-MLP kernel
    # via scalar-prefetched i/j and in-kernel row gathers.
    pos_i, pos_j = pos[i], pos[j]
    x_i, x_j = x[i], x[j]

    edge_emb = edge_mlp_pallas(pos_i, pos_j, x_i, x_j,
                               params["edge_w"], params["edge_b"],
                               tile_r=tile_r, mxu_dtype=mxu_dtype)   # [E, latent]

    aggr = scatter_sum_pallas(edge_emb, j, x.shape[0],
                              n_tile=n_tile, e_tile=e_tile)          # [N, latent]

    return node_mlp_pallas(x, aggr, params["node_w"], params["node_b"],
                           tile_r=tile_r, mxu_dtype=mxu_dtype)       # [N, latent]


# TODO(synk): the batched [B, N, C] path of the PyTorch forward is the same
# compute vmapped over B; it is not exposed here.


# --------------------------------------------------------------------------
# Pure-JAX reference for validation
# --------------------------------------------------------------------------
def _mlp_ref(x, ws, bs, layer_norm=True, eps=1e-5):
    n = len(ws)
    h = x
    for l, (w, b) in enumerate(zip(ws, bs)):
        h = jnp.dot(h, w, precision=jax.lax.Precision.HIGHEST) + b
        if l < n - 1:
            h = jnp.maximum(h, 0.0)
    if layer_norm:
        mean = jnp.mean(h, axis=-1, keepdims=True)
        var = jnp.mean(jnp.square(h - mean), axis=-1, keepdims=True)
        h = (h - mean) * jax.lax.rsqrt(var + eps)
    return h


def gmp_forward_ref(params, x, g, pos):
    i, j = g[0], g[1]
    dir_ = pos[i] - pos[j]
    norm = jnp.sqrt(jnp.sum(dir_ * dir_, axis=-1, keepdims=True))
    edge_in = jnp.concatenate([dir_, norm, x[i], x[j]], axis=-1)
    edge_emb = _mlp_ref(edge_in, params["edge_w"], params["edge_b"])
    aggr = jnp.zeros((x.shape[0], edge_emb.shape[1]), edge_emb.dtype).at[j].add(edge_emb)
    node_in = jnp.concatenate([x, aggr], axis=-1)
    return _mlp_ref(node_in, params["node_w"], params["node_b"]) + x


if __name__ == "__main__":
    latent_dim, hidden_layer, pos_dim = 32, 2, 3

    key = jax.random.PRNGKey(0)
    kp, kx, kpos, kg = jax.random.split(key, 4)
    params = init_gmp(kp, latent_dim, hidden_layer, pos_dim)

    # --- test 1: tiny graph (single tile everywhere) --------------------------
    N, E = 16, 32
    x = jax.random.normal(kx, (N, latent_dim), jnp.float32)
    pos = jax.random.normal(kpos, (N, pos_dim), jnp.float32)
    g = jax.random.randint(kg, (2, E), 0, N, jnp.int32)

    out = jax.block_until_ready(gmp_forward(params, x, g, pos))
    assert out.shape == (N, latent_dim) and out.dtype == jnp.float32
    ref = jax.block_until_ready(gmp_forward_ref(params, x, g, pos))
    err1 = float(jnp.max(jnp.abs(out - ref)))
    assert err1 < 2e-3, f"test1 max err {err1}"

    # --- test 2: multi-tile graph (exercises segmented scatter + row tiling) --
    N2, E2 = 192, 1000
    kx2, kpos2, kg2 = jax.random.split(jax.random.PRNGKey(1), 3)
    x2 = jax.random.normal(kx2, (N2, latent_dim), jnp.float32)
    pos2 = jax.random.normal(kpos2, (N2, pos_dim), jnp.float32)
    g2 = jax.random.randint(kg2, (2, E2), 0, N2, jnp.int32)

    out2 = jax.block_until_ready(
        gmp_forward(params, x2, g2, pos2, tile_r=128, n_tile=32, e_tile=128))
    ref2 = jax.block_until_ready(gmp_forward_ref(params, x2, g2, pos2))
    err2 = float(jnp.max(jnp.abs(out2 - ref2)))
    assert err2 < 5e-3, f"test2 max err {err2}"

    print("KERNEL_OK")
</pallas_src>

<mosaic_0001>
module attributes {stable_mosaic.version = 11 : i64} {
  func.func @_probe(%arg0: memref<256x32xf32, #tpu.memory_space<vmem>>, %arg1: memref<64x128xf32, #tpu.memory_space<vmem>>) attributes {dimension_semantics = [], scalar_prefetch = 0 : i64, scratch_operands = 0 : i64, tpu.core_type = #tpu.core_type<tc>} {
    %c0 = arith.constant 0 : index
    %c0_0 = arith.constant 0 : index
    %0 = vector.load %arg0[%c0, %c0_0] : memref<256x32xf32, #tpu.memory_space<vmem>>, vector<256x32xf32>
    %1 = vector.shape_cast %0 : vector<256x32xf32> to vector<64x128xf32>
    %c0_1 = arith.constant 0 : index
    %c0_2 = arith.constant 0 : index
    %2 = vector.load %arg1[%c0_1, %c0_2] : memref<64x128xf32, #tpu.memory_space<vmem>>, vector<64x128xf32>
    tpu.vector_store %arg1[%c0_1, %c0_2], %1 {strides = array<i32>} : memref<64x128xf32, #tpu.memory_space<vmem>>, vector<64x128xf32>,
    return
  }
}

module attributes {stable_mosaic.version = 11 : i64} {
  func.func @kernel(%arg0: i32, %arg1: memref<32x3xf32, #tpu.memory_space<vmem>>, %arg2: memref<32x3xf32, #tpu.memory_space<vmem>>, %arg3: memref<32x32xf32, #tpu.memory_space<vmem>>, %arg4: memref<32x32xf32, #tpu.memory_space<vmem>>, %arg5: memref<3x32xf32, #tpu.memory_space<vmem>>, %arg6: memref<1x32xf32, #tpu.memory_space<vmem>>, %arg7: memref<32x32xf32, #tpu.memory_space<vmem>>, %arg8: memref<32x32xf32, #tpu.memory_space<vmem>>, %arg9: memref<1x32xf32, #tpu.memory_space<vmem>>, %arg10: memref<32x32xf32, #tpu.memory_space<vmem>>, %arg11: memref<1x32xf32, #tpu.memory_space<vmem>>, %arg12: memref<32x32xf32, #tpu.memory_space<vmem>>, %arg13: memref<1x32xf32, #tpu.memory_space<vmem>>, %arg14: memref<32x32xf32, #tpu.memory_space<vmem>>) attributes {dimension_semantics = [#tpu.dimension_semantics<parallel>], iteration_bounds = array<i64: 1>, scalar_prefetch = 0 : i64, scratch_operands = 0 : i64, tpu.core_type = #tpu.core_type<tc>, window_params = [{transform_indices = @transform_0, window_bounds = array<i64: 32, 3>}, {transform_indices = @transform_1, window_bounds = array<i64: 32, 3>}, {transform_indices = @transform_2, window_bounds = array<i64: 32, 32>}, {transform_indices = @transform_3, window_bounds = array<i64: 32, 32>}, {pipeline_mode = #tpu.pipeline_mode<synchronous>, transform_indices = @transform_4, window_bounds = array<i64: 3, 32>}, {pipeline_mode = #tpu.pipeline_mode<synchronous>, transform_indices = @transform_5, window_bounds = array<i64: 1, 32>}, {pipeline_mode = #tpu.pipeline_mode<synchronous>, transform_indices = @transform_6, window_bounds = array<i64: 32, 32>}, {pipeline_mode = #tpu.pipeline_mode<synchronous>, transform_indices = @transform_7, window_bounds = array<i64: 32, 32>}, {pipeline_mode = #tpu.pipeline_mode<synchronous>, transform_indices = @transform_8, window_bounds = array<i64: 1, 32>}, {pipeline_mode = #tpu.pipeline_mode<synchronous>, transform_indices = @transform_9, window_bounds = array<i64: 32, 32>}, {pipeline_mode = #tpu.pipeline_mode<synchronous>, transform_indices = @transform_10, window_bounds = array<i64: 1, 32>}, {pipeline_mode = #tpu.pipeline_mode<synchronous>, transform_indices = @transform_11, window_bounds = array<i64: 32, 32>}, {pipeline_mode = #tpu.pipeline_mode<synchronous>, transform_indices = @transform_12, window_bounds = array<i64: 1, 32>}, {transform_indices = @transform_13, window_bounds = array<i64: 32, 32>}]} {
    %c0 = arith.constant 0 : index
    %c0_0 = arith.constant 0 : index
    %0 = vector.load %arg1[%c0, %c0_0] : memref<32x3xf32, #tpu.memory_space<vmem>>, vector<32x3xf32>
    %c0_1 = arith.constant 0 : index
    %c0_2 = arith.constant 0 : index
    %1 = vector.load %arg2[%c0_1, %c0_2] : memref<32x3xf32, #tpu.memory_space<vmem>>, vector<32x3xf32>
    %2 = arith.subf %0, %1 : vector<32x3xf32>
    %3 = arith.mulf %2, %2 : vector<32x3xf32>
    %cst = arith.constant dense<0.000000e+00> : vector<32xf32>
    %4 = vector.multi_reduction <add>, %3, %cst [1] : vector<32x3xf32> to vector<32xf32>
    %5 = vector.shape_cast %4 : vector<32xf32> to vector<32x1xf32>
    %6 = math.sqrt %5 : vector<32x1xf32>
    %c0_3 = arith.constant 0 : index
    %c0_4 = arith.constant 0 : index
    %7 = vector.load %arg5[%c0_3, %c0_4] : memref<3x32xf32, #tpu.memory_space<vmem>>, vector<3x32xf32>
    %cst_5 = arith.constant dense<0.000000e+00> : vector<32x32xf32>
    %8 = tpu.matmul %2, %7, %cst_5 {dimension_numbers = #tpu.dot_dimension_numbers<[1], [0], [0], [1], [0, 0, 1, 1], [], []>} : vector<32x3xf32>, vector<3x32xf32>, vector<32x32xf32> -> vector<32x32xf32>
    %c0_6 = arith.constant 0 : index
    %c0_7 = arith.constant 0 : index
    %9 = vector.load %arg6[%c0_6, %c0_7] : memref<1x32xf32, #tpu.memory_space<vmem>>, vector<1x32xf32>
    %10 = vector.broadcast %6 : vector<32x1xf32> to vector<32x32xf32>
    %11 = vector.broadcast %9 : vector<1x32xf32> to vector<32x32xf32>
    %12 = arith.mulf %10, %11 : vector<32x32xf32>
    %13 = arith.addf %8, %12 : vector<32x32xf32>
    %c0_8 = arith.constant 0 : index
    %c0_9 = arith.constant 0 : index
    %14 = vector.load %arg3[%c0_8, %c0_9] : memref<32x32xf32, #tpu.memory_space<vmem>>, vector<32x32xf32>
    %c0_10 = arith.constant 0 : index
    %c0_11 = arith.constant 0 : index
    %15 = vector.load %arg7[%c0_10, %c0_11] : memref<32x32xf32, #tpu.memory_space<vmem>>, vector<32x32xf32>
    %cst_12 = arith.constant dense<0.000000e+00> : vector<32x32xf32>
    %16 = tpu.matmul %14, %15, %cst_12 {dimension_numbers = #tpu.dot_dimension_numbers<[1], [0], [0], [1], [0, 0, 1, 1], [], []>} : vector<32x32xf32>, vector<32x32xf32>, vector<32x32xf32> -> vector<32x32xf32>
    %17 = arith.addf %13, %16 : vector<32x32xf32>
    %c0_13 = arith.constant 0 : index
    %c0_14 = arith.constant 0 : index
    %18 = vector.load %arg4[%c0_13, %c0_14] : memref<32x32xf32, #tpu.memory_space<vmem>>, vector<32x32xf32>
    %c0_15 = arith.constant 0 : index
    %c0_16 = arith.constant 0 : index
    %19 = vector.load %arg8[%c0_15, %c0_16] : memref<32x32xf32, #tpu.memory_space<vmem>>, vector<32x32xf32>
    %cst_17 = arith.constant dense<0.000000e+00> : vector<32x32xf32>
    %20 = tpu.matmul %18, %19, %cst_17 {dimension_numbers = #tpu.dot_dimension_numbers<[1], [0], [0], [1], [0, 0, 1, 1], [], []>} : vector<32x32xf32>, vector<32x32xf32>, vector<32x32xf32> -> vector<32x32xf32>
    %21 = arith.addf %17, %20 : vector<32x32xf32>
    %c0_18 = arith.constant 0 : index
    %c0_19 = arith.constant 0 : index
    %22 = vector.load %arg9[%c0_18, %c0_19] : memref<1x32xf32, #tpu.memory_space<vmem>>, vector<1x32xf32>
    %23 = vector.broadcast %22 : vector<1x32xf32> to vector<32x32xf32>
    %24 = arith.addf %21, %23 : vector<32x32xf32>
    %cst_20 = arith.constant 0.000000e+00 : f32
    %25 = vector.broadcast %cst_20 : f32 to vector<32x32xf32>
    %26 = arith.maximumf %24, %25 : vector<32x32xf32>
    %c0_21 = arith.constant 0 : index
    %c0_22 = arith.constant 0 : index
    %27 = vector.load %arg10[%c0_21, %c0_22] : memref<32x32xf32, #tpu.memory_space<vmem>>, vector<32x32xf32>
    %c0_23 = arith.constant 0 : index
    %c0_24 = arith.constant 0 : index
    %28 = vector.load %arg11[%c0_23, %c0_24] : memref<1x32xf32, #tpu.memory_space<vmem>>, vector<1x32xf32>
    %cst_25 = arith.constant dense<0.000000e+00> : vector<32x32xf32>
    %29 = tpu.matmul %26, %27, %cst_25 {dimension_numbers = #tpu.dot_dimension_numbers<[1], [0], [0], [1], [0, 0, 1, 1], [], []>} : vector<32x32xf32>, vector<32x32xf32>, vector<32x32xf32> -> vector<32x32xf32>
    %30 = vector.broadcast %28 : vector<1x32xf32> to vector<32x32xf32>
    %31 = arith.addf %29, %30 : vector<32x32xf32>
    %cst_26 = arith.constant 0.000000e+00 : f32
    %32 = vector.broadcast %cst_26 : f32 to vector<32x32xf32>
    %33 = arith.maximumf %31, %32 : vector<32x32xf32>
    %c0_27 = arith.constant 0 : index
    %c0_28 = arith.constant 0 : index
    %34 = vector.load %arg12[%c0_27, %c0_28] : memref<32x32xf32, #tpu.memory_space<vmem>>, vector<32x32xf32>
    %c0_29 = arith.constant 0 : index
    %c0_30 = arith.constant 0 : index
    %35 = vector.load %arg13[%c0_29, %c0_30] : memref<1x32xf32, #tpu.memory_space<vmem>>, vector<1x32xf32>
    %cst_31 = arith.constant dense<0.000000e+00> : vector<32x32xf32>
    %36 = tpu.matmul %33, %34, %cst_31 {dimension_numbers = #tpu.dot_dimension_numbers<[1], [0], [0], [1], [0, 0, 1, 1], [], []>} : vector<32x32xf32>, vector<32x32xf32>, vector<32x32xf32> -> vector<32x32xf32>
    %37 = vector.broadcast %35 : vector<1x32xf32> to vector<32x32xf32>
    %38 = arith.addf %36, %37 : vector<32x32xf32>
    %cst_32 = arith.constant dense<0.000000e+00> : vector<32xf32>
    %39 = vector.multi_reduction <add>, %38, %cst_32 [1] : vector<32x32xf32> to vector<32xf32>
    %40 = vector.shape_cast %39 : vector<32xf32> to vector<32x1xf32>
    %cst_33 = arith.constant 3.200000e+01 : f32
    %41 = vector.broadcast %cst_33 : f32 to vector<32x1xf32>
    %42 = arith.divf %40, %41 : vector<32x1xf32>
    %43 = vector.broadcast %42 : vector<32x1xf32> to vector<32x32xf32>
    %44 = arith.subf %38, %43 : vector<32x32xf32>
    %45 = arith.mulf %44, %44 : vector<32x32xf32>
    %cst_34 = arith.constant dense<0.000000e+00> : vector<32xf32>
    %46 = vector.multi_reduction <add>, %45, %cst_34 [1] : vector<32x32xf32> to vector<32xf32>
    %47 = vector.shape_cast %46 : vector<32xf32> to vector<32x1xf32>
    %cst_35 = arith.constant 3.200000e+01 : f32
    %48 = vector.broadcast %cst_35 : f32 to vector<32x1xf32>
    %49 = arith.divf %47, %48 : vector<32x1xf32>
    %50 = vector.broadcast %42 : vector<32x1xf32> to vector<32x32xf32>
    %51 = arith.subf %38, %50 : vector<32x32xf32>
    %cst_36 = arith.constant 9.99999974E-6 : f32
    %52 = vector.broadcast %cst_36 : f32 to vector<32x1xf32>
    %53 = arith.addf %49, %52 : vector<32x1xf32>
    %54 = math.rsqrt %53 : vector<32x1xf32>
    %55 = vector.broadcast %54 : vector<32x1xf32> to vector<32x32xf32>
    %56 = arith.mulf %51, %55 : vector<32x32xf32>
    %c0_37 = arith.constant 0 : index
    %c0_38 = arith.constant 0 : index
    %57 = vector.load %arg14[%c0_37, %c0_38] : memref<32x32xf32, #tpu.memory_space<vmem>>, vector<32x32xf32>
    tpu.vector_store %arg14[%c0_37, %c0_38], %56 {strides = array<i32>} : memref<32x32xf32, #tpu.memory_space<vmem>>, vector<32x32xf32>,
    return
  }
  func.func @transform_0(%arg0: i32) -> (i32, i32) {
    %c0_i32 = arith.constant 0 : i32
    %c0_i32_0 = arith.constant 0 : i32
    return %arg0, %c0_i32 : i32, i32
  }
  func.func @transform_1(%arg0: i32) -> (i32, i32) {
    %c0_i32 = arith.constant 0 : i32
    %c0_i32_0 = arith.constant 0 : i32
    return %arg0, %c0_i32 : i32, i32
  }
  func.func @transform_2(%arg0: i32) -> (i32, i32) {
    %c0_i32 = arith.constant 0 : i32
    %c0_i32_0 = arith.constant 0 : i32
    return %arg0, %c0_i32 : i32, i32
  }
  func.func @transform_3(%arg0: i32) -> (i32, i32) {
    %c0_i32 = arith.constant 0 : i32
    %c0_i32_0 = arith.constant 0 : i32
    return %arg0, %c0_i32 : i32, i32
  }
  func.func @transform_4(%arg0: i32) -> (i32, i32) {
    %c0_i32 = arith.constant 0 : i32
    %c0_i32_0 = arith.constant 0 : i32
    %c0_i32_1 = arith.constant 0 : i32
    return %c0_i32, %c0_i32_0 : i32, i32
  }
  func.func @transform_5(%arg0: i32) -> (i32, i32) {
    %c0_i32 = arith.constant 0 : i32
    %c0_i32_0 = arith.constant 0 : i32
    %c0_i32_1 = arith.constant 0 : i32
    return %c0_i32, %c0_i32_0 : i32, i32
  }
  func.func @transform_6(%arg0: i32) -> (i32, i32) {
    %c0_i32 = arith.constant 0 : i32
    %c0_i32_0 = arith.constant 0 : i32
    %c0_i32_1 = arith.constant 0 : i32
    return %c0_i32, %c0_i32_0 : i32, i32
  }
  func.func @transform_7(%arg0: i32) -> (i32, i32) {
    %c0_i32 = arith.constant 0 : i32
    %c0_i32_0 = arith.constant 0 : i32
    %c0_i32_1 = arith.constant 0 : i32
    return %c0_i32, %c0_i32_0 : i32, i32
  }
  func.func @transform_8(%arg0: i32) -> (i32, i32) {
    %c0_i32 = arith.constant 0 : i32
    %c0_i32_0 = arith.constant 0 : i32
    %c0_i32_1 = arith.constant 0 : i32
    return %c0_i32, %c0_i32_0 : i32, i32
  }
  func.func @transform_9(%arg0: i32) -> (i32, i32) {
    %c0_i32 = arith.constant 0 : i32
    %c0_i32_0 = arith.constant 0 : i32
    %c0_i32_1 = arith.constant 0 : i32
    return %c0_i32, %c0_i32_0 : i32, i32
  }
  func.func @transform_10(%arg0: i32) -> (i32, i32) {
    %c0_i32 = arith.constant 0 : i32
    %c0_i32_0 = arith.constant 0 : i32
    %c0_i32_1 = arith.constant 0 : i32
    return %c0_i32, %c0_i32_0 : i32, i32
  }
  func.func @transform_11(%arg0: i32) -> (i32, i32) {
    %c0_i32 = arith.constant 0 : i32
    %c0_i32_0 = arith.constant 0 : i32
    %c0_i32_1 = arith.constant 0 : i32
    return %c0_i32, %c0_i32_0 : i32, i32
  }
  func.func @transform_12(%arg0: i32) -> (i32, i32) {
    %c0_i32 = arith.constant 0 : i32
    %c0_i32_0 = arith.constant 0 : i32
    %c0_i32_1 = arith.constant 0 : i32
    return %c0_i32, %c0_i32_0 : i32, i32
  }
  func.func @transform_13(%arg0: i32) -> (i32, i32) {
    %c0_i32 = arith.constant 0 : i32
    %c0_i32_0 = arith.constant 0 : i32
    return %arg0, %c0_i32 : i32, i32
  }
}

</mosaic_0001>

<bundles_post_ra>
// kernel: tpu_custom_call.1
= control target key start
LH: loop header
LB: loop body
LE: loop exit
PB: predicated region body
PF: predicated region fallthrough
CT: control target
= control target key end

     0   :  { %18 = vsyncpa [#allocation3], 0  ;;  %s1366_s0 = inlined_call_operand.vmem [shape: f32[32,3], index: 0, kind: input, shape index: {}]   ;;  %s1367_s1 = inlined_call_operand.vmem [shape: f32[32,3], index: 1, kind: input, shape index: {}]   ;;  %s1368_s2 = inlined_call_operand.vmem [shape: f32[32,32], index: 2, kind: input, shape index: {}]   ;;  %s1369_s3 = inlined_call_operand.vmem [shape: f32[32,32], index: 3, kind: input, shape index: {}]   ;;  %s1370_s4 = inlined_call_operand.hbm [shape: f32[3,32], index: 4, kind: input, shape index: {}]   ;;  %s1371_s5 = inlined_call_operand.vmem [shape: f32[1,32], index: 5, kind: input, shape index: {}]   ;;  %s1372_s6 = inlined_call_operand.hbm [shape: f32[32,32], index: 6, kind: input, shape index: {}]   ;;  %s1373_s7 = inlined_call_operand.vmem [shape: f32[32,32], index: 7, kind: input, shape index: {}]   ;;  %s1374_s8 = inlined_call_operand.vmem [shape: f32[1,32], index: 8, kind: input, shape index: {}]   ;;  %s1375_s9 = inlined_call_operand.hbm [shape: f32[32,32], index: 9, kind: input, shape index: {}]   ;;  %s1376_s10 = inlined_call_operand.vmem [shape: f32[1,32], index: 10, kind: input, shape index: {}]   ;;  %s1377_s11 = inlined_call_operand.hbm [shape: f32[32,32], index: 11, kind: input, shape index: {}]   ;;  %s1378_s12 = inlined_call_operand.vmem [shape: f32[1,32], index: 12, kind: input, shape index: {}]   ;;  %s1379_s13 = inlined_call_operand.hbm [shape: f32[32,32], index: 13, kind: output, shape index: {}]  }
   0x1   :  { %19 = vsyncpa [#allocation6], 0 }
   0x2   :  { %20 = vsyncpa [#allocation9], 0 }
   0x3   :  { %21 = vsyncpa [#allocation4], 0  ;;  %s1109_s25 = smov [#allocation5]   ;;  %s991_s29 = scalar_lea.hbm %s1372_s6, 512 }
   0x4   :  { %s47_s26 = sshll.u32 %s1109_s25, 4  ;;  %p992_p0 = scmp.ne.s32.totalorder %s1372_s6, %s991_s29  ;;  %s48_s26 = int_to_ptr.vmem [resolvable:$true] %s47_s26 }
   0x5   :  { %p995_p1 = scmp.lt.u32.totalorder %s991_s29, %s1372_s6 }
   0x7   :  { %p997_p2 = pnand %p995_p1, %p992_p0 }
   0x9   :  { %1000 = shalt.err (!%p997_p2)
}
   0xa   :  { %s1001_s17 = scalar_lea.vmem %s48_s26, 512  ;;  %p1006_p4 = scmp.lt.s32.totalorder %s48_s26, %s48_s26 }
   0xb   :  { %p1002_p3 = scmp.ne.s32.totalorder %s48_s26, %s1001_s17  ;;  %p1007_p5 = scmp.lt.s32.totalorder %s1001_s17, %s1001_s17 }
   0xd   :  { %p1008_p6 = por %p1007_p5, %p1006_p4 }
   0xf   :  { %p1009_p7 = pnand %p1008_p6, %p1002_p3 }
  0x11   :  { %1012 = shalt.err (!%p1009_p7)
}
  0x12   :  { %s1110_s18 = smov 128   ;;  %s1111_s19 = smov 8  }
  0x13   :  { %53 = dma.hbm_to_vmem [thread:$0]  %s1372_s6, 512, %s48_s26, [#allocation6], %s1110_s18, %s1110_s18, %s1111_s19  }
  0x14   :  { %s1112_s22 = smov [#allocation2]   ;;  %s1113_s24 = smov [#allocation7]  }
  0x15   :  { %s36_s23 = sshll.u32 %s1112_s22, 4  ;;  %s63_s25 = sshll.u32 %s1113_s24, 4  ;;  %s37_s23 = int_to_ptr.vmem [resolvable:$true] %s36_s23  ;;  %s64_s25 = int_to_ptr.vmem [resolvable:$true] %s63_s25 }
  0x16   :  { %s1013_s29 = scalar_lea.hbm %s1370_s4, 64 }
  0x17   :  { %p1014_p8 = scmp.ne.s32.totalorder %s1370_s4, %s1013_s29  ;;  %p1017_p9 = scmp.lt.u32.totalorder %s1013_s29, %s1370_s4 }
  0x19   :  { %p1019_p10 = pnand %p1017_p9, %p1014_p8 }
  0x1b   :  { %1022 = shalt.err (!%p1019_p10)
}
  0x1c   :  { %s1023_s6 = scalar_lea.vmem %s37_s23, 64  ;;  %p1028_p12 = scmp.lt.s32.totalorder %s37_s23, %s37_s23 }
  0x1d   :  { %p1024_p11 = scmp.ne.s32.totalorder %s37_s23, %s1023_s6  ;;  %p1029_p13 = scmp.lt.s32.totalorder %s1023_s6, %s1023_s6 }
  0x1f   :  { %p1030_p0 = por %p1029_p13, %p1028_p12 }
  0x21   :  { %p1031_p1 = pnand %p1030_p0, %p1024_p11 }
  0x23   :  { %1034 = shalt.err (!%p1031_p1)
}
  0x24   :  { %39 = dma.hbm_to_vmem [thread:$0]  %s1370_s4, 64, %s37_s23, [#allocation3]  }
  0x25   :  { %s1035_s22 = scalar_lea.hbm %s1375_s9, 512 }
  0x26   :  { %p1036_p2 = scmp.ne.s32.totalorder %s1375_s9, %s1035_s22  ;;  %p1039_p3 = scmp.lt.u32.totalorder %s1035_s22, %s1375_s9 }
  0x28   :  { %p1041_p4 = pnand %p1039_p3, %p1036_p2 }
  0x2a   :  { %1044 = shalt.err (!%p1041_p4)
}
  0x2b   :  { %s1045_s30 = scalar_lea.vmem %s64_s25, 512  ;;  %p1050_p6 = scmp.lt.s32.totalorder %s64_s25, %s64_s25 }
  0x2c   :  { %p1046_p5 = scmp.ne.s32.totalorder %s64_s25, %s1045_s30  ;;  %p1051_p7 = scmp.lt.s32.totalorder %s1045_s30, %s1045_s30 }
  0x2e   :  { %p1052_p8 = por %p1051_p7, %p1050_p6 }
  0x30   :  { %p1053_p9 = pnand %p1052_p8, %p1046_p5 }
  0x32   :  { %1056 = shalt.err (!%p1053_p9)
}
  0x33   :  { %69 = dma.hbm_to_vmem [thread:$0]  %s1375_s9, 512, %s64_s25, [#allocation6], %s1110_s18, %s1110_s18, %s1111_s19  }
  0x34   :  { %s1114_s14 = smov [#allocation8]   ;;  %s1057_s26 = scalar_lea.hbm %s1377_s11, 512 }
  0x35   :  { %s77_s15 = sshll.u32 %s1114_s14, 4  ;;  %p1058_p10 = scmp.ne.s32.totalorder %s1377_s11, %s1057_s26  ;;  %s78_s15 = int_to_ptr.vmem [resolvable:$true] %s77_s15 }
  0x36   :  { %p1061_p11 = scmp.lt.u32.totalorder %s1057_s26, %s1377_s11 }
  0x38   :  { %p1063_p12 = pnand %p1061_p11, %p1058_p10 }
  0x3a   :  { %1066 = shalt.err (!%p1063_p12)
}
  0x3b   :  { %s1067_s24 = scalar_lea.vmem %s78_s15, 512  ;;  %p1072_p0 = scmp.lt.s32.totalorder %s78_s15, %s78_s15 }
  0x3c   :  { %p1068_p13 = scmp.ne.s32.totalorder %s78_s15, %s1067_s24  ;;  %p1073_p1 = scmp.lt.s32.totalorder %s1067_s24, %s1067_s24 }
  0x3e   :  { %p1074_p2 = por %p1073_p1, %p1072_p0 }
  0x40   :  { %p1075_p3 = pnand %p1074_p2, %p1068_p13 }
  0x42   :  { %1078 = shalt.err (!%p1075_p3)
}
  0x43   :  { %83 = dma.hbm_to_vmem [thread:$0]  %s1377_s11, 512, %s78_s15, [#allocation9], %s1110_s18, %s1110_s18, %s1111_s19  }
  0x44   :  { %1101 = dma.done.wait [#allocation3], 64  }
  0x45   :  { %1102 = vsyncadd [#allocation3], 4294967232 }
  0x46   :  { %1103 = dma.done.wait [#allocation6], 1024  }
  0x47   :  { %1104 = vsyncadd [#allocation6], 4294966272 }
  0x48   :  { %1105 = dma.done.wait [#allocation9], 512  }
  0x49   :  { %1106 = vsyncadd [#allocation9], 4294966784  ;;  %vm179_vm0 = vcmask 1042432   ;;  %v155_v0 = vld [vmem:[#allocation2] sm:$0x7]  ;;  %vm114_vm1 = vcmask 23552  }
  0x4a   :  { %v98_v1 = vld [vmem:[%s1366_s0] sm:$0xff]  ;;  %860 = vmatprep.subr.msk.mxu0 %vm179_vm0, %v155_v0  ;;  %v273_v5 = vld [vmem:[#allocation5 + $0x8] sm:$0xff]  ;;  %v274_v13 = vld [vmem:[#allocation5 + $0x10] sm:$0xff]  ;;  %vm276_vm2 = vcmask 261120  }
  0x4b   :  { %v102_v2 = vld [vmem:[%s1367_s1] sm:$0xff]  ;;  %v99_v6 = vld [vmem:[%s1366_s0 + $0x8] sm:$0xff]  ;;  %861 = vmatpush3.msk.msra.mxu0 %vm179_vm0, %v155_v0  ;;  %v100_v9 = vld [vmem:[%s1366_s0 + $0x10] sm:$0xff] }
  0x4c   :  { %v106_v3 = vsub.f32 %v98_v1, %v102_v2  ;;  %v272_v4 = vld [vmem:[#allocation5] sm:$0xff]  ;;  %v104_v10 = vld [vmem:[%s1367_s1 + $0x10] sm:$0xff]  ;;  %v275_v14 = vld [vmem:[#allocation5 + $0x18] sm:$0xff] }
  0x4d   :  { %v924_v7 = vpack.c.bf16 %v273_v5, %v272_v4  ;;  %v103_v8 = vld [vmem:[%s1367_s1 + $0x8] sm:$0xff]  ;;  %v108_v12 = vsub.f32 %v100_v9, %v104_v10  ;;  %v101_v15 = vld [vmem:[%s1366_s0 + $0x18] sm:$0xff]  ;;  %v928_v17 = vpack.c.bf16 %v275_v14, %v274_v13  ;;  %v382_v19 = vld [vmem:[%s1373_s7] sm:$0xff] }
  0x4e   :  { %862 = vmatprep.mubr.msk.f32.mxu0 %vm114_vm1, %v106_v3  ;;  %v107_v11 = vsub.f32 %v99_v6, %v103_v8  ;;  %v110_v16 = vmul.f32 %v106_v3, %v106_v3  ;;  %v105_v18 = vld [vmem:[%s1367_s1 + $0x18] sm:$0xff]  ;;  %v383_v21 = vld [vmem:[%s1373_s7 + $0x8] sm:$0xff]  ;;  %v268_v25 = vld [vmem:[%s1368_s2] sm:$0xff] }
  0x4f   :  { %925 = vmatprep.subr.bf16.mxu0 %v924_v7  ;;  %v109_v20 = vsub.f32 %v101_v15, %v105_v18  ;;  %v112_v23 = vmul.f32 %v108_v12, %v108_v12  ;;  %v932_v26 = vpack.c.bf16 %v383_v21, %v382_v19  ;;  %v384_v29 = vld [vmem:[%s1373_s7 + $0x10] sm:$0xff]  ;;  %v385_v30 = vld [vmem:[%s1373_s7 + $0x18] sm:$0xff]  ;;  %v269_v33 = vld [vmem:[%s1368_s2 + $0x8] sm:$0xff] }
  0x50   :  { %863 = vmatmul.mubr.msk.f32.vlgmr.msra.gmra.mrb[0].mxu0 %vm114_vm1, %v107_v11  ;;  %v115_v22 = vsel %vm114_vm1, %v110_v16, 0.0  ;;  %v111_v24 = vmul.f32 %v107_v11, %v107_v11  ;;  %v270_v34 = vld [vmem:[%s1368_s2 + $0x10] sm:$0xff]  ;;  %v936_v35 = vpack.c.bf16 %v385_v30, %v384_v29  ;;  %v271_v36 = vld [vmem:[%s1368_s2 + $0x18] sm:$0xff]  ;;  %v378_v37 = vld [vmem:[%s1369_s3] sm:$0xff] }
  0x51   :  { %927 = vmatpush3.bf16.msra.mxu0 %v924_v7  ;;  %865 = vmatprep.mubr.msk.f32.mxu0 %vm114_vm1, %v108_v12  ;;  %v121_v27 = vsel %vm114_vm1, %v112_v23, 0.0  ;;  %v113_v28 = vmul.f32 %v109_v20, %v109_v20  ;;  %v379_v38 = vld [vmem:[%s1369_s3 + $0x8] sm:$0xff]  ;;  %v380_v39 = vld [vmem:[%s1369_s3 + $0x10] sm:$0xff]  ;;  %v381_v40 = vld [vmem:[%s1369_s3 + $0x18] sm:$0xff] }
  0x52   :  { %929 = vmatprep.subr.bf16.mxu0 %v928_v17  ;;  %116 = vadd.xlane.f32.xlu0 %v115_v22  ;;  %v118_v31 = vsel %vm114_vm1, %v111_v24, 0.0  ;;  %v502_v41 = vld [vmem:[#allocation7] sm:$0xff]  ;;  %v503_v42 = vld [vmem:[#allocation7 + $0x8] sm:$0xff]  ;;  %v504_v44 = vld [vmem:[#allocation7 + $0x10] sm:$0xff] }
  0x53   :  { %122 = vadd.xlane.f32.xlu1 %v121_v27  ;;  %v124_v32 = vsel %vm114_vm1, %v113_v28, 0.0  ;;  %v940_v43 = vpack.c.bf16 %v503_v42, %v502_v41  ;;  %v505_v45 = vld [vmem:[#allocation7 + $0x18] sm:$0xff]  ;;  %v614_v47 = vld [vmem:[#allocation8] sm:$0xff]  ;;  %v615_v48 = vld [vmem:[#allocation8 + $0x8] sm:$0xff] }
  0x54   :  { %866 = vmatmul.mubr.msk.f32.gmra.mrb[2].mxu0 %vm114_vm1, %v109_v20  ;;  %v944_v46 = vpack.c.bf16 %v505_v45, %v504_v44  ;;  %v948_v49 = vpack.c.bf16 %v615_v48, %v614_v47  ;;  %v798_v4 = vld [vmem:[%s1371_s5] ss:$0 sm:$0xff] }
  0x55   :  { %931 = vmatpush3.bf16.msra.mxu0 %v928_v17  ;;  %876 = vmatprep.mubr.msk.f32.mxu0 %vm276_vm2, %v268_v25  ;;  %v812_v11 = vld [vmem:[%s1374_s8] ss:$0 sm:$0xff] }
  0x56   :  { %933 = vmatprep.subr.bf16.mxu0 %v932_v26  ;;  %119 = vadd.xlane.f32.xlu0 %v118_v31  ;;  %v818_v48 = vld [vmem:[%s1378_s12] ss:$0 sm:$0xff]  ;;  %s1115_s12 = smov [#allocation10]  }
  0x57   :  { %125 = vadd.xlane.f32.xlu1 %v124_v32  ;;  %941 = vmatprep.subr.bf16.mxu1 %v940_v43  ;;  %v616_v32 = vld [vmem:[#allocation8 + $0x10] sm:$0xff]  ;;  %s784_s1 = sshll.u32 %s1115_s12, 4  ;;  %s785_s1 = int_to_ptr.vmem [resolvable:$true] %s784_s1 }
  0x58   :  { %877 = vmatmul.mubr.msk.f32.vlgmr.msra.gmra.mrb[0].mxu0 %vm276_vm2, %v269_v33  ;;  %943 = vmatpush3.bf16.msra.mxu1 %v940_v43  ;;  %v617_v33 = vld [vmem:[#allocation8 + $0x18] sm:$0xff]  ;;  %s1079_s28 = scalar_lea.vmem %s785_s1, 512  ;;  %p1084_p5 = scmp.lt.s32.totalorder %s785_s1, %s785_s1 }
  0x59   :  { %935 = vmatpush3.bf16.msra.mxu0 %v932_v26  ;;  %879 = vmatprep.mubr.msk.f32.mxu0 %vm276_vm2, %v270_v34  ;;  %v952_v34 = vpack.c.bf16 %v617_v33, %v616_v32  ;;  %p1080_p4 = scmp.ne.s32.totalorder %s785_s1, %s1079_s28  ;;  %p1085_p6 = scmp.lt.s32.totalorder %s1079_s28, %s1079_s28 }
  0x5a   :  { %937 = vmatprep.subr.bf16.mxu0 %v936_v35  ;;  %945 = vmatprep.subr.bf16.mxu1 %v944_v46 }
  0x5b   :  { %p1086_p7 = por %p1085_p6, %p1084_p5 }
  0x5c   :  { %880 = vmatmul.mubr.msk.f32.gmra.mrb[2].mxu0 %vm276_vm2, %v271_v36  ;;  %947 = vmatpush3.bf16.msra.mxu1 %v944_v46 }
  0x5d   :  { %939 = vmatpush3.bf16.msra.mxu0 %v936_v35  ;;  %890 = vmatprep.mubr.msk.f32.mxu0 %vm276_vm2, %v378_v37  ;;  %v813_v35 = vld [vmem:[%s1376_s10] ss:$0 sm:$0xff]  ;;  %p1087_p8 = pnand %p1086_p7, %p1080_p4 }
  0x5e   :  { %949 = vmatprep.subr.bf16.mxu1 %v948_v49 }
  0x60   :  { %891 = vmatmul.mubr.msk.f32.vlgmr.msra.gmra.mrb[0].mxu0 %vm276_vm2, %v379_v38 }
  0x61   :  { %893 = vmatprep.mubr.msk.f32.mxu0 %vm276_vm2, %v380_v39 }
  0x64   :  { %894 = vmatmul.mubr.msk.f32.gmra.mrb[2].mxu0 %vm276_vm2, %v381_v40 }
  0xdf   :  { %v117_v50 = vpop.xlane.xlu0 %116 }
  0xe0   :  { %v123_v51 = vpop.xlane.xlu1 %122  ;;  %vm129_vm4 = vcmp.eq.f32.partialorder %v117_v50, inf  ;;  %v132_v62 = vand.u32 2147483648, %v117_v50  ;;  %vm131_vm6 = vcmp.eq.f32.partialorder %v117_v50, 0.0 }
  0xe1   :  { %vm143_vm8 = vcmp.eq.f32.partialorder %v123_v51, inf  ;;  %v146_v7 = vand.u32 2147483648, %v123_v51  ;;  %vm145_vm10 = vcmp.eq.f32.partialorder %v123_v51, 0.0 }
  0xe3   :  { %v120_v52 = vpop.xlane.xlu0 %119 }
  0xe4   :  { %975 = vrsqrt.f32 %v120_v52  ;;  %v126_v53 = vpop.xlane.xlu1 %125  ;;  %vm136_vm3 = vcmp.eq.f32.partialorder %v120_v52, inf  ;;  %v139_v60 = vand.u32 2147483648, %v120_v52  ;;  %vm138_vm5 = vcmp.eq.f32.partialorder %v120_v52, 0.0 }
  0xe5   :  { %977 = vrsqrt.f32 %v117_v50  ;;  %vm150_vm7 = vcmp.eq.f32.partialorder %v126_v53, inf  ;;  %v153_v3 = vand.u32 2147483648, %v126_v53  ;;  %vm152_vm9 = vcmp.eq.f32.partialorder %v126_v53, 0.0 }
  0xe6   :  { %979 = vrsqrt.f32 %v126_v53 }
  0xe7   :  { %981 = vrsqrt.f32 %v123_v51 }
  0xee   :  { %v976_v54 = vpop.eup %975 }
  0xef   :  { %v978_v55 = vpop.eup %977  ;;  %v135_v56 = vmul.f32 %v976_v54, %v120_v52 }
  0xf0   :  { %v980_v57 = vpop.eup %979  ;;  %v128_v58 = vmul.f32 %v978_v55, %v117_v50 }
  0xf1   :  { %v982_v59 = vpop.eup %981  ;;  %v137_v61 = vsel %vm136_vm3, %v120_v52, %v135_v56  ;;  %v149_v63 = vmul.f32 %v980_v57, %v126_v53 }
  0xf2   :  { %v130_v0 = vsel %vm129_vm4, %v117_v50, %v128_v58  ;;  %v142_v1 = vmul.f32 %v982_v59, %v123_v51  ;;  %v140_v2 = vsel %vm138_vm5, %v139_v60, %v137_v61 }
  0xf3   :  { %v133_v5 = vsel %vm131_vm6, %v132_v62, %v130_v0  ;;  %v151_v6 = vsel %vm150_vm7, %v126_v53, %v149_v63  ;;  %v164_v9 = vmul.f32 %v798_v4, %v140_v2 }
  0xf4   :  { %v144_v8 = vsel %vm143_vm8, %v123_v51, %v142_v1  ;;  %v163_v12 = vmul.f32 %v798_v4, %v133_v5  ;;  %v154_v13 = vsel %vm152_vm9, %v153_v3, %v151_v6 }
  0xf5   :  { %v147_v16 = vsel %vm145_vm10, %v146_v7, %v144_v8  ;;  %v166_v19 = vmul.f32 %v798_v4, %v154_v13 }
  0xf6   :  { %v165_v21 = vmul.f32 %v798_v4, %v147_v16 }
 0x133   :  { %v892_v10 = vpop.f32.mrb[0].mxu0 }
 0x134   :  { %v956_v14 = vadd.f32 %v892_v10, %v164_v9  ;;  %v464_v15 = vpop.f32.mrb[1].mxu0 }
 0x135   :  { %v957_v17 = vadd.f32 %v464_v15, %v163_v12 }
 0x136   :  { %v495_v18 = vadd.f32 %v956_v14, %v812_v11 }
 0x137   :  { %v895_v20 = vpop.f32.mrb[2].mxu0  ;;  %v494_v22 = vadd.f32 %v957_v17, %v812_v11 }
 0x138   :  { %v958_v23 = vadd.f32 %v895_v20, %v166_v19  ;;  %v474_v24 = vpop.f32.mrb[3].mxu0  ;;  %v499_v27 = vmax.f32 %v495_v18, 0.0 }
 0x139   :  { %v959_v25 = vadd.f32 %v474_v24, %v165_v21  ;;  %v498_v26 = vmax.f32 %v494_v22, 0.0 }
 0x13a   :  { %v497_v28 = vadd.f32 %v958_v23, %v812_v11 }
 0x13b   :  { %v496_v29 = vadd.f32 %v959_v25, %v812_v11  ;;  %904 = vmatprep.mubr.msk.f32.mxu1 %vm276_vm2, %v498_v26 }
 0x13c   :  { %905 = vmatmul.mubr.msk.f32.vlgmr.msra.gmra.mrb[0].mxu1 %vm276_vm2, %v499_v27  ;;  %v501_v31 = vmax.f32 %v497_v28, 0.0 }
 0x13d   :  { %v500_v30 = vmax.f32 %v496_v29, 0.0  ;;  %951 = vmatpush3.bf16.msra.mxu1 %v948_v49 }
 0x13e   :  { %953 = vmatprep.subr.bf16.mxu1 %v952_v34 }
 0x13f   :  { %907 = vmatprep.mubr.msk.f32.mxu1 %vm276_vm2, %v500_v30 }
 0x140   :  { %908 = vmatmul.mubr.msk.f32.gmra.mrb[2].mxu1 %vm276_vm2, %v501_v31 }
 0x141   :  { %955 = vmatpush3.bf16.msra.mxu1 %v952_v34 }
 0x20f   :  { %v906_v36 = vpop.f32.mrb[0].mxu1 }
 0x210   :  { %v597_v37 = vadd.f32 %v906_v36, %v813_v35  ;;  %v591_v38 = vpop.f32.mrb[1].mxu1 }
 0x211   :  { %v592_v39 = vadd.f32 %v813_v35, %v591_v38 }
 0x212   :  { %v611_v42 = vmax.f32 %v597_v37, 0.0 }
 0x213   :  { %v610_v40 = vmax.f32 %v592_v39, 0.0  ;;  %v909_v41 = vpop.f32.mrb[2].mxu1 }
 0x214   :  { %v607_v43 = vadd.f32 %v909_v41, %v813_v35  ;;  %v601_v44 = vpop.f32.mrb[3].mxu1 }
 0x215   :  { %v602_v45 = vadd.f32 %v813_v35, %v601_v44  ;;  %918 = vmatprep.mubr.msk.f32.mxu1 %vm276_vm2, %v610_v40 }
 0x216   :  { %919 = vmatmul.mubr.msk.f32.vlgmr.msra.gmra.mrb[4].mxu1 %vm276_vm2, %v611_v42  ;;  %v613_v47 = vmax.f32 %v607_v43, 0.0 }
 0x217   :  { %v612_v46 = vmax.f32 %v602_v45, 0.0 }
 0x219   :  { %921 = vmatprep.mubr.msk.f32.mxu1 %vm276_vm2, %v612_v46 }
 0x21a   :  { %922 = vmatmul.mubr.msk.f32.gmra.mrb[6].mxu1 %vm276_vm2, %v613_v47 }
 0x2e9   :  { %v920_v49 = vpop.f32.mrb[4].mxu1 }
 0x2ea   :  { %v709_v50 = vadd.f32 %v920_v49, %v818_v48  ;;  %v703_v51 = vpop.f32.mrb[5].mxu1 }
 0x2eb   :  { %v704_v52 = vadd.f32 %v818_v48, %v703_v51 }
 0x2ec   :  { %v725_v53 = vsel %vm276_vm2, %v709_v50, 0.0 }
 0x2ed   :  { %726 = vadd.xlane.f32.xlu1 %v725_v53  ;;  %v923_v54 = vpop.f32.mrb[6].mxu1  ;;  %v722_v55 = vsel %vm276_vm2, %v704_v52, 0.0 }
 0x2ee   :  { %v719_v56 = vadd.f32 %v923_v54, %v818_v48  ;;  %v713_v57 = vpop.f32.mrb[7].mxu1  ;;  %723 = vadd.xlane.f32.xlu0 %v722_v55 }
 0x2ef   :  { %v714_v58 = vadd.f32 %v818_v48, %v713_v57 }
 0x2f0   :  { %v731_v59 = vsel %vm276_vm2, %v719_v56, 0.0 }
 0x2f1   :  { %732 = vadd.xlane.f32.xlu1 %v731_v59  ;;  %v728_v60 = vsel %vm276_vm2, %v714_v58, 0.0 }
 0x2f2   :  { %729 = vadd.xlane.f32.xlu0 %v728_v60 }
 0x37a   :  { %v727_v61 = vpop.xlane.xlu1 %726 }
 0x37b   :  { %v736_v62 = vmul.f32 0.03125, %v727_v61  ;;  %v724_v63 = vpop.xlane.xlu0 %723 }
 0x37c   :  { %v735_v0 = vmul.f32 0.03125, %v724_v63 }
 0x37d   :  { %v740_v1 = vsub.f32 %v709_v50, %v736_v62 }
 0x37e   :  { %v739_v2 = vsub.f32 %v704_v52, %v735_v0  ;;  %v733_v3 = vpop.xlane.xlu1 %732 }
 0x37f   :  { %v738_v4 = vmul.f32 0.03125, %v733_v3  ;;  %v730_v5 = vpop.xlane.xlu0 %729  ;;  %v744_v6 = vmul.f32 %v740_v1, %v740_v1 }
 0x380   :  { %v737_v7 = vmul.f32 0.03125, %v730_v5  ;;  %v743_v8 = vmul.f32 %v739_v2, %v739_v2 }
 0x381   :  { %v742_v9 = vsub.f32 %v719_v56, %v738_v4  ;;  %v750_v10 = vsel %vm276_vm2, %v744_v6, 0.0 }
 0x382   :  { %v741_v11 = vsub.f32 %v714_v58, %v737_v7  ;;  %751 = vadd.xlane.f32.xlu1 %v750_v10  ;;  %v747_v12 = vsel %vm276_vm2, %v743_v8, 0.0 }
 0x383   :  { %748 = vadd.xlane.f32.xlu0 %v747_v12  ;;  %v746_v13 = vmul.f32 %v742_v9, %v742_v9 }
 0x384   :  { %v745_v14 = vmul.f32 %v741_v11, %v741_v11 }
 0x385   :  { %v756_v15 = vsel %vm276_vm2, %v746_v13, 0.0 }
 0x386   :  { %757 = vadd.xlane.f32.xlu1 %v756_v15  ;;  %v753_v16 = vsel %vm276_vm2, %v745_v14, 0.0 }
 0x387   :  { %754 = vadd.xlane.f32.xlu0 %v753_v16 }
 0x40f   :  { %v752_v17 = vpop.xlane.xlu1 %751 }
 0x410   :  { %v760_v18 = vmul.f32 0.03125, %v752_v17  ;;  %v749_v19 = vpop.xlane.xlu0 %748 }
 0x411   :  { %v759_v20 = vmul.f32 0.03125, %v749_v19 }
 0x412   :  { %v764_v21 = vadd.f32 1e-05, %v760_v18 }
 0x413   :  { %v763_v22 = vadd.f32 1e-05, %v759_v20  ;;  %v758_v23 = vpop.xlane.xlu1 %757 }
 0x414   :  { %983 = vrsqrt.f32 %v764_v21  ;;  %v762_v24 = vmul.f32 0.03125, %v758_v23  ;;  %v755_v25 = vpop.xlane.xlu0 %754 }
 0x415   :  { %985 = vrsqrt.f32 %v763_v22  ;;  %v761_v26 = vmul.f32 0.03125, %v755_v25 }
 0x416   :  { %v766_v27 = vadd.f32 1e-05, %v762_v24 }
 0x417   :  { %v765_v28 = vadd.f32 1e-05, %v761_v26 }
 0x418   :  { %987 = vrsqrt.f32 %v766_v27 }
 0x419   :  { %989 = vrsqrt.f32 %v765_v28 }
 0x41e   :  { %v984_v29 = vpop.eup %983 }
 0x41f   :  { %v986_v30 = vpop.eup %985  ;;  %v772_v31 = vmul.f32 %v984_v29, %v740_v1 }
 0x420   :  { %v771_v32 = vmul.f32 %v986_v30, %v739_v2 }
 0x421   :  { %776 = vst.msk [vmem:[#allocation10 + $0x8] sm:$0xff] %vm276_vm2, %v772_v31 }
 0x422   :  { %v988_v33 = vpop.eup %987  ;;  %775 = vst.msk [vmem:[#allocation10] sm:$0xff] %vm276_vm2, %v771_v32 }
 0x423   :  { %v990_v34 = vpop.eup %989  ;;  %v774_v35 = vmul.f32 %v988_v33, %v742_v9 }
 0x424   :  { %v773_v36 = vmul.f32 %v990_v34, %v741_v11 }
 0x425   :  { %778 = vst.msk [vmem:[#allocation10 + $0x18] sm:$0xff] %vm276_vm2, %v774_v35 }
 0x426   :  { %777 = vst.msk [vmem:[#allocation10 + $0x10] sm:$0xff] %vm276_vm2, %v773_v36 }
 0x427   :  { %1090 = shalt.err (!%p1087_p8)
}
 0x428   :  { %s1091_s11 = scalar_lea.hbm %s1379_s13, 512 }
 0x429   :  { %p1092_p9 = scmp.ne.s32.totalorder %s1379_s13, %s1091_s11  ;;  %p1095_p10 = scmp.lt.u32.totalorder %s1091_s11, %s1379_s13 }
 0x42b   :  { %p1097_p11 = pnand %p1095_p10, %p1092_p9 }
 0x42d   :  { %1100 = shalt.err (!%p1097_p11)
}
 0x42e   :  { %790 = dma.vmem_to_hbm [thread:$0]  %s785_s1, 512, %s1379_s13, [#allocation4], %s1110_s18, %s1110_s18, %s1111_s19  }
 0x42f   :  { %1107 = dma.done.wait [#allocation4], 512  }
 0x430   :  { %1108 = vsyncadd [#allocation4], 4294966784 }
 0x431   :  { %794 = vsyncpa [#allocation3], 1 }
 0x432   :  { %795 = vsyncpa [#allocation6], 1 }
 0x433   :  { %796 = vsyncpa [#allocation9], 1 }
 0x434   :  { %797 = vsyncpa [#allocation4], 1 }

</bundles_post_ra>
